<compile_context>
chip_gen: v7x
topology: tpu7x:2x2x1
jax: 0.10.0
libtpu: 0.0.40
codegen_flags: <defaults>
</compile_context>

<pallas_src>
import functools

import jax
import jax.numpy as jnp
from jax.experimental import pallas as pl
from jax.experimental.pallas import tpu as pltpu

_MIB = 1024 * 1024


def _round_up(x, m):
    return ((x + m - 1) // m) * m


def _padded_vmem_plane_bytes(h, w, itemsize):
    # VMEM lays the trailing two dims out in (8*pack, 128) tiles; sub-32-bit
    # dtypes pack along sublanes.  This is what one (.., h, w) slice actually
    # occupies in VMEM (NOT h*w*itemsize).
    pack = max(1, 4 // max(1, itemsize))
    return _round_up(h, 8 * pack) * _round_up(w, 128) * itemsize


def _pick_pair_budget_bytes():
    # Generation-aware padded-VMEM budget for one (input block + output block)
    # pair.  Double-buffered pairs plus Mosaic internal scratch stay well under
    # the explicit scoped-VMEM limit requested below on every generation
    # (v5e/v6e: 128 MiB physical VMEM, v7x: 64 MiB physical).
    try:
        cap = pltpu.get_tpu_info().vmem_capacity_bytes
        if cap >= 100 * _MIB:       # v5e / v6e class parts
            return 12 * _MIB
        return 8 * _MIB             # v7x class parts (smaller physical VMEM)
    except Exception:
        return 8 * _MIB             # conservative fallback


def _crop_kernel(x_ref, o_ref, *, rows, cols, H, W):
    # x_ref: (blk, H, W) VMEM tile; o_ref: (blk, out_h, out_w) VMEM tile.
    # Static slice offsets -> a single strided relayout copy per block; the
    # output block is full-extent in its trailing dims, so its HBM writeback
    # is a plain dense block DMA handled by the auto-pipeline.
    o_ref[...] = x_ref[:, rows:H - rows, cols:W - cols]


def make_crop_layer(crop_set):
    """Mirrors CropLayer.__init__: crop_set entries are <= 0."""
    rows_to_crop = -crop_set[0]
    cols_to_crop = -crop_set[1]
    assert rows_to_crop >= 0
    assert cols_to_crop >= 0
    # NOTE: the reference PyTorch forward uses [r:-r, c:-c]; with r==0 or c==0
    # that Python slice is empty, so (like the reference) we require > 0 here
    # to reproduce the meaningful (non-degenerate) forward semantics.
    assert rows_to_crop > 0 and cols_to_crop > 0, (
        "reference forward uses [r:-r, c:-c]; r==0 or c==0 yields an empty "
        "tensor in PyTorch slicing"
    )

    def forward(x):
        N, C, H, W = x.shape
        out_h = H - 2 * rows_to_crop
        out_w = W - 2 * cols_to_crop
        assert out_h > 0 and out_w > 0, "crop exceeds spatial dims"

        itemsize = jnp.dtype(x.dtype).itemsize
        nc = N * C

        # ---- Block sizing over the fused (N*C) axis (padded-VMEM aware) ----
        in_plane = _padded_vmem_plane_bytes(H, W, itemsize)
        out_plane = _padded_vmem_plane_bytes(out_h, out_w, itemsize)
        pair = in_plane + out_plane
        budget = _pick_pair_budget_bytes()
        blk = int(max(1, min(nc, budget // pair)))
        # v7x megacore: keep at least 2 (balanced) blocks so neither
        # TensorCore idles; no-op when the grid is already multi-block.
        if nc >= 2:
            blk = min(blk, pl.cdiv(nc, 2))
        n_blocks = pl.cdiv(nc, blk)   # ragged tail block handled by masking

        # Explicit scoped-VMEM limit covering double-buffered in+out blocks
        # plus Mosaic-internal scratch headroom; safe on all generations.
        # (For very large single planes blk==1 may still exceed this — such
        # shapes would need spatial tiling too, which MnasNet never hits.)
        vmem_limit = int(min(32 * _MIB, max(16 * _MIB, 2 * blk * pair + 4 * _MIB)))

        kernel = functools.partial(
            _crop_kernel, rows=rows_to_crop, cols=cols_to_crop, H=H, W=W
        )

        bytes_accessed = nc * (H * W + out_h * out_w) * itemsize

        y = pl.pallas_call(
            kernel,
            out_shape=jax.ShapeDtypeStruct((nc, out_h, out_w), x.dtype),
            grid_spec=pltpu.PrefetchScalarGridSpec(
                num_scalar_prefetch=0,
                grid=(n_blocks,),
                in_specs=[pl.BlockSpec((blk, H, W), lambda i: (i, 0, 0))],
                out_specs=pl.BlockSpec(
                    (blk, out_h, out_w), lambda i: (i, 0, 0)
                ),
            ),
            compiler_params=pltpu.CompilerParams(
                dimension_semantics=("parallel",),
                vmem_limit_bytes=vmem_limit,
            ),
            cost_estimate=pl.CostEstimate(
                flops=0, transcendentals=0, bytes_accessed=bytes_accessed
            ),
        )(x.reshape(nc, H, W))          # free contiguous reshape

        return y.reshape(N, C, out_h, out_w)   # free contiguous reshape back

    return forward


if __name__ == "__main__":
    # Case 1: the module's canonical small NCHW input.
    key = jax.random.PRNGKey(0)
    N, C, H, W = 2, 4, 16, 16
    x = jax.random.normal(key, (N, C, H, W), dtype=jnp.float32)

    crop_layer = make_crop_layer((-1, -1))  # rows_to_crop = 1, cols_to_crop = 1
    out = jax.block_until_ready(crop_layer(x))

    ref = x[:, :, 1:-1, 1:-1]
    assert out.shape == ref.shape, (out.shape, ref.shape)
    assert jnp.array_equal(out, ref), "mismatch vs reference crop (case 1)"

    # Case 2: odd sizes / asymmetric crop / prime channel count with N=1 to
    # exercise the fused N*C axis, the ragged tail block, and the >=2-block
    # megacore split.
    x2 = jax.random.normal(jax.random.PRNGKey(0), (1, 3, 13, 21),
                           dtype=jnp.float32)
    crop_layer2 = make_crop_layer((-2, -3))  # rows_to_crop = 2, cols_to_crop = 3
    out2 = jax.block_until_ready(crop_layer2(x2))

    ref2 = x2[:, :, 2:-2, 3:-3]
    assert out2.shape == ref2.shape, (out2.shape, ref2.shape)
    assert jnp.array_equal(out2, ref2), "mismatch vs reference crop (case 2)"

    print("KERNEL_OK")
</pallas_src>

<mosaic_0001>
module attributes {stable_mosaic.version = 11 : i64} {
  func.func @_crop_kernel(%arg0: i32, %arg1: memref<4x16x16xf32, #tpu.memory_space<vmem>>, %arg2: memref<4x14x14xf32, #tpu.memory_space<vmem>>) attributes {dimension_semantics = [#tpu.dimension_semantics<parallel>], iteration_bounds = array<i64: 2>, scalar_prefetch = 0 : i64, scratch_operands = 0 : i64, tpu.core_type = #tpu.core_type<tc>, window_params = [{transform_indices = @transform_0, window_bounds = array<i64: 4, 16, 16>}, {transform_indices = @transform_1, window_bounds = array<i64: 4, 14, 14>}]} {
    %c0 = arith.constant 0 : index
    %c1 = arith.constant 1 : index
    %c1_0 = arith.constant 1 : index
    %0 = vector.load %arg1[%c0, %c1, %c1_0] : memref<4x16x16xf32, #tpu.memory_space<vmem>>, vector<4x14x14xf32>
    %c0_1 = arith.constant 0 : index
    %c0_2 = arith.constant 0 : index
    %c0_3 = arith.constant 0 : index
    %1 = vector.load %arg2[%c0_1, %c0_2, %c0_3] : memref<4x14x14xf32, #tpu.memory_space<vmem>>, vector<4x14x14xf32>
    tpu.vector_store %arg2[%c0_1, %c0_2, %c0_3], %0 {strides = array<i32>} : memref<4x14x14xf32, #tpu.memory_space<vmem>>, vector<4x14x14xf32>,
    return
  }
  func.func @transform_0(%arg0: i32) -> (i32, i32, i32) {
    %c0_i32 = arith.constant 0 : i32
    %c0_i32_0 = arith.constant 0 : i32
    %c0_i32_1 = arith.constant 0 : i32
    return %arg0, %c0_i32, %c0_i32_0 : i32, i32, i32
  }
  func.func @transform_1(%arg0: i32) -> (i32, i32, i32) {
    %c0_i32 = arith.constant 0 : i32
    %c0_i32_0 = arith.constant 0 : i32
    %c0_i32_1 = arith.constant 0 : i32
    return %arg0, %c0_i32, %c0_i32_0 : i32, i32, i32
  }
}

</mosaic_0001>

<bundles_post_ra>
// kernel: tpu_custom_call.1
= control target key start
LH: loop header
LB: loop body
LE: loop exit
PB: predicated region body
PF: predicated region fallthrough
CT: control target
= control target key end

     0   :  { %6 = vsyncpa [#allocation3], 0  ;;  %s512_s0 = inlined_call_operand.hbm [shape: f32[8,16,16], index: 0, kind: input, shape index: {}]   ;;  %s513_s1 = inlined_call_operand.vmem [shape: f32[8,14,14], index: 1, kind: output, shape index: {}]  }
   0x1   :  { %8 = vsyncpa [#allocation3 + $0x1], 0  ;;  %s401_s6 = smov 0   ;;  %s403_s7 = smov 0  }
   0x2   :  { %s405_s8 = smov 0   ;;  %s407_s9 = smov 0  }
   0x3 LB: > { %s261_s10 = sadd.s32 4294967295, %s385_s9   ;;  %s421_s11 = sadd.s32 1, %s385_s9   ;;  %s385_s9 = sphi %s407_s9, %s520_s9   ;;  %s381_s8 = sphi %s405_s8, %s519_s8   ;;  %s377_s7 = sphi %s403_s7, %s518_s7   ;;  %s373_s6 = sphi %s401_s6, %s517_s6  }
   0x4   : > { %s18_s12 = ssub.s32 %s385_s9, %s421_s11  ;;  %s21_s13 = sadd.s32 1, %s381_s8 }
   0x5   : > { %p19_p0 = scmp.eq.s32.totalorder %s18_s12, 0  ;;  %p28_p1 = scmp.ne.s32.totalorder %s381_s8, %s377_s7 }
   0x6   : > { %p29_p2 = scmp.eq.s32.totalorder %s385_s9, 0  ;;  %p34_p3 = scmp.ne.s32.totalorder %s377_s7, %s373_s6 }
   0x7   : > { %s431_s14 = scalar_select %p19_p0, %s381_s8, %s21_s13  }
   0x8   : > { %p30_p4 = por %p29_p2, %p28_p1  ;;  %p35_p5 = scmp.eq.s32.totalorder %s261_s10, 0 }
   0x9   : > { %p285_p6 = scmp.lt.s32.totalorder %s385_s9, 2  ;;  %s84_s16 = sand.u32 1, %s381_s8  }
   0xa   : > { %p436_p7 = por %p35_p5, %p34_p3  ;;  %s265_s17 = sshll.u32 %s84_s16, 6 }
   0xb   : > { %s277_s18 = sshll.u32 %s385_s9, 10  ;;  %s88_s22 = scalar_lea.vmem [#allocation2], %s265_s17 }
   0xc   : > { %s445_s21 = scalar_lea.hbm %s512_s0, %s277_s18  ;;  %s96_s23 = sshll.u32 %s88_s22, 4  ;;  %s447_s23 = int_to_ptr.vmem [resolvable:$true] %s96_s23 }
   0xd   : > { %p449_p8 = pnand %p285_p6, %p30_p4  ;;  %s454_s25 = scalar_lea.sflag [#allocation3], %s84_s16 }
   0xe   : > { %s321_s26 = scalar_lea.hbm %s445_s21, 1024  ;;  %s326_s29 = scalar_lea.hbm %s512_s0, 2048 }
   0xf   : > { %p322_p10 = scmp.ne.s32.totalorder %s445_s21, %s321_s26  ;;  %p323_p11 = pneg %p449_p8 }
  0x10   : > { %p327_p0 = scmp.lt.u32.totalorder %s445_s21, %s512_s0  ;;  %p328_p1 = scmp.lt.u32.totalorder %s326_s29, %s321_s26 }
  0x11   : > { %p324_p12 = pnand %p323_p11, %p322_p10  ;;  %p330_p3 = scmp.lt.u32.totalorder %s321_s26, %s445_s21 }
  0x12   : > { %p329_p2 = por %p328_p1, %p327_p0 }
  0x13   : > { %p325_p13 = pneg %p324_p12 }
  0x14   : > { %p331_p4 = por %p330_p3, %p329_p2 }
  0x16   : > { %p332_p5 = pnand %p331_p4, %p325_p13 }
  0x18   : > { %335 = shalt.err (!%p332_p5)
}
  0x19   : > { %s336_s3 = scalar_lea.vmem %s447_s23, 1024  ;;  %s387_s4 = smov [#allocation2]  }
  0x1a   : > { %p337_p6 = scmp.ne.s32.totalorder %s447_s23, %s336_s3  ;;  %s341_s5 = sshll.u32 %s387_s4, 4  ;;  %s342_s5 = int_to_ptr.vmem [resolvable:$false] %s341_s5 }
  0x1b   : > { %s343_s6 = scalar_lea.vmem %s342_s5, 2048  ;;  %p344_p9 = scmp.lt.s32.totalorder %s447_s23, %s342_s5 }
  0x1c   : > { %p339_p10 = pnand %p337_p6, %p323_p11  ;;  %p345_p0 = scmp.lt.s32.totalorder %s343_s6, %s336_s3 }
  0x1e   : > { %p340_p12 = pneg %p339_p10  ;;  %p346_p1 = por %p345_p0, %p344_p9 }
  0x20   : > { %p347_p2 = pnand %p346_p1, %p340_p12 }
  0x22   : > { %350 = shalt.err (!%p347_p2)
}
  0x23   : > { %s388_s12 = smov 128   ;;  %s389_s13 = smov 8  }
  0x24   : > { %284 = dma.hbm_to_vmem [thread:$0]  (!%p449_p8), %s445_s21, 1024, %s447_s23, %s454_s25, %s388_s12, %s388_s12, %s389_s13  }
  0x25   : > { %p104_p11 = scmp.lt.s32.totalorder %s385_s9, 3  ;;  %p516_p13 = scmp.ge.s32.totalorder %s385_s9, 1 }
  0x27   : > { %p105_p3 = pnand %p516_p13, %p104_p11 }
  0x28   : > { %s110_s16 = sand.u32 (!%p105_p3), 1, %s377_s7  }
  0x29   : > { %108 = sbr.rel (%p105_p3) target bundleno = 179 (0xb3), region = 24  ;;  %s270_s17 = sshll.u32 (!%p105_p3), %s110_s16, 6 }
  0x2a   : > { %s111_s18 = scalar_lea.sflag (!%p105_p3), [#allocation3], %s110_s16  ;;  %s114_s19 = scalar_lea.vmem (!%p105_p3), [#allocation2], %s270_s17 }
  0x30   : > { %368 = dma.done.wait (%p436_p7), %s111_s18, 1024  }
  0x31   : > { %370 = vsyncadd (%p436_p7), %s111_s18, 4294966272  ;;  %v144_v0 = vld [vmem:[%s114_s19 + $0x11] sm:$0xff]  ;;  %v142_v1 = vld [vmem:[%s114_s19 + $0x1] sm:$0xff]  ;;  %s390_s20 = smov 127   ;;  %s271_s15 = sshll.u32 %s261_s10, 2  ;;  %vm182_vm0 = vcmask 113664  }
  0x32   : > { %162 = vrot.lane.b32.xlu1 %v144_v0, %s390_s20  ;;  %158 = vrot.lane.b32.xlu0 %v142_v1, %s390_s20  ;;  %v145_v2 = vld [vmem:[%s114_s19 + $0x19] sm:$0x3f]  ;;  %v143_v3 = vld [vmem:[%s114_s19 + $0x9] sm:$0x3f]  ;;  %p136_p7 = scmp.lt.s32.totalorder %s271_s15, 7  ;;  %vm184_vm1 = vcmask 111616  }
  0x33   : > { %v147_v4 = vld [vmem:[%s114_s19 + $0x29] sm:$0x3f]  ;;  %v146_v5 = vld [vmem:[%s114_s19 + $0x21] sm:$0xff]  ;;  %v149_v6 = vld [vmem:[%s114_s19 + $0x39] sm:$0x3f] }
  0x34   : > { %v148_v7 = vld [vmem:[%s114_s19 + $0x31] sm:$0xff]  ;;  %s522_s15 = smov (!%p136_p7, %s271_s15), 7 }
  0x35   : > { %s278_s21 = sshll.u32 %s522_s15, 4 }
  0x36   : > { %164 = vrot.lane.b32.xlu1 %v145_v2, %s390_s20  ;;  %160 = vrot.lane.b32.xlu0 %v143_v3, %s390_s20  ;;  %s140_s24 = scalar_lea.vmem %s513_s1, %s278_s21 }
  0x3a   : > { %168 = vrot.lane.b32.xlu1 %v147_v4, %s390_s20  ;;  %166 = vrot.lane.b32.xlu0 %v146_v5, %s390_s20 }
  0x3e   : > { %172 = vrot.lane.b32.xlu1 %v149_v6, %s390_s20  ;;  %170 = vrot.lane.b32.xlu0 %v148_v7, %s390_s20 }
  0xa4   : > { %v163_v8 = vpop.permute.xlu1 %162  ;;  %v159_v9 = vpop.permute.xlu0 %158 }
  0xa5   : > { %183 = vst.msk [vmem:[%s140_s24] sm:$0xff] %vm182_vm0, %v159_v9  ;;  %186 = vst.msk [vmem:[%s140_s24 + $0x10] sm:$0xff] %vm182_vm0, %v163_v8 }
  0xa8   : > { %v165_v10 = vpop.permute.xlu1 %164  ;;  %v161_v11 = vpop.permute.xlu0 %160 }
  0xa9   : > { %185 = vst.msk [vmem:[%s140_s24 + $0x8] sm:$0x3f] %vm184_vm1, %v161_v11  ;;  %187 = vst.msk [vmem:[%s140_s24 + $0x18] sm:$0x3f] %vm184_vm1, %v165_v10 }
  0xac   : > { %v169_v12 = vpop.permute.xlu1 %168  ;;  %v167_v13 = vpop.permute.xlu0 %166 }
  0xad   : > { %189 = vst.msk [vmem:[%s140_s24 + $0x28] sm:$0x3f] %vm184_vm1, %v169_v12 }
  0xae   : > { %188 = vst.msk [vmem:[%s140_s24 + $0x20] sm:$0xff] %vm182_vm0, %v167_v13 }
  0xb0   : > { %v173_v14 = vpop.permute.xlu1 %172  ;;  %v171_v15 = vpop.permute.xlu0 %170 }
  0xb1   : > { %191 = vst.msk [vmem:[%s140_s24 + $0x38] sm:$0x3f] %vm184_vm1, %v173_v14 }
  0xb2   : > { %190 = vst.msk [vmem:[%s140_s24 + $0x30] sm:$0xff] %vm182_vm0, %v171_v15 }
  0xb3 PF: > { %p11_p8 = scmp.ge.s32.totalorder %s421_s11, 4   ;;  %s517_s6 = smov %s377_s7 }
  0xb4   : > { %s518_s7 = smov %s381_s8  ;;  %s519_s8 = smov %s431_s14 }
  0xb5   : > { %s520_s9 = smov %s421_s11  ;;  %13 = sbr.rel (!%p11_p8) target bundleno = 3 (0x3), region = 64 }
  0xbc   :  { %216 = vsyncpa [#allocation3], 1 }
  0xbd   :  { %218 = vsyncpa [#allocation3 + $0x1], 1 }

</bundles_post_ra>
